<compile_context>
chip_gen: v7x
topology: tpu7x:2x2x1
jax: 0.10.0
libtpu: 0.0.40
codegen_flags: <defaults>
</compile_context>

<pallas_src>
import functools

import jax
import jax.numpy as jnp
from jax import lax
from jax.experimental import pallas as pl
from jax.experimental.pallas import tpu as pltpu
import numpy as np

KH = KW = 3     # kernel_size
PAD = 1         # padding
POOL = 2        # MaxPool2d(2)
BN_EPS = 1e-5


def _round_up(a, b):
    return -(-a // b) * b


def conv_sandwich_kernel(x_ref, w_ref, shift_ref, o_ref, *, wp, acc_w, out_w):
    """Fused Conv2d + bias + BatchNorm(eval) + ReLU + MaxPool2d(2).

    x_ref:     (N*Cin, XL)            zero-padded input, row-major (HP x WP) flat per row
    w_ref:     (KH*KW, N*Cout, N*Cin) block-diagonal, BN-scale-folded conv weights per tap
    shift_ref: (N*Cout, 1)            folded conv-bias + BatchNorm shift
    o_ref:     (N*Cout, out_w)        ReLU(2x2 window max) at every flat position
    """
    rows = o_ref.shape[0]

    # Conv as 9 accumulating MXU matmuls over statically shifted lane slices.
    acc = jnp.zeros((rows, acc_w), jnp.float32)
    for kh in range(KH):
        for kw in range(KW):
            shift = kh * wp + kw                      # static lane shift of this tap
            acc = acc + jnp.dot(w_ref[kh * KW + kw],
                                x_ref[:, pl.ds(shift, acc_w)],
                                preferred_element_type=jnp.float32)

    # Folded conv bias + BatchNorm(eval) shift, per output channel (lane broadcast).
    acc = acc + shift_ref[...]

    # MaxPool2d(2): 2x2 window max at every flat position (pure VPU maxes over
    # shifted lane slices); the wrapper keeps only the even (i, j) positions.
    pooled = jnp.maximum(
        jnp.maximum(acc[:, 0:out_w], acc[:, 1:out_w + 1]),
        jnp.maximum(acc[:, wp:wp + out_w], acc[:, wp + 1:wp + 1 + out_w]))

    # ReLU (monotone -> commutes with the max-pool), f32 epilogue.
    o_ref[...] = jnp.maximum(pooled, 0.0)


@jax.jit
def conv_sandwich(x_nchw, w_oihw, bias, gamma, beta, run_mean, run_var):
    """Forward pass of ConvSandwich. Input/output in PyTorch NCHW convention."""
    N, Cin, H, W = x_nchw.shape
    Cout = w_oihw.shape[0]
    HP, WP = H + 2 * PAD, W + 2 * PAD                 # 18, 18
    out_w = H * WP                                    # kernel writes flat o = i*WP + j, i < H
    acc_w = _round_up(out_w + WP + 1, 128)            # conv accumulator lane width
    xlanes = _round_up(acc_w + (KH - 1) * WP + (KW - 1), 128)   # input lane slack for shifts

    # ---------- BatchNorm(eval) folding (tiny per-channel XLA ops) ----------
    scale = gamma / jnp.sqrt(run_var + BN_EPS)                         # (Cout,)
    shift = (bias - run_mean) * scale + beta                           # (Cout,)
    w_scaled = w_oihw.astype(jnp.float32) * scale[:, None, None, None]  # (Cout,Cin,3,3)

    # Block-diagonal per-tap weights: image n's output rows only see image n's input rows.
    eye_n = jnp.eye(N, dtype=jnp.float32)
    w_blk = jnp.einsum('nm,ochw->hwnomc', eye_n, w_scaled)
    w_blk = w_blk.reshape(KH * KW, N * Cout, N * Cin)
    shift_col = jnp.tile(shift.astype(jnp.float32), N).reshape(N * Cout, 1)

    # ---------- input layout plumbing: pad spatially, (n,cin)->sublanes ----------
    xp = jnp.pad(x_nchw.astype(jnp.float32),
                 ((0, 0), (0, 0), (PAD, PAD), (PAD, PAD)))             # (N, Cin, HP, WP)
    x_flat = xp.reshape(N * Cin, HP * WP)
    x_flat = jnp.pad(x_flat, ((0, 0), (0, xlanes - HP * WP)))          # (N*Cin, xlanes)

    kernel = functools.partial(conv_sandwich_kernel, wp=WP, acc_w=acc_w, out_w=out_w)

    flops = 2 * (N * Cout) * (N * Cin) * acc_w * KH * KW
    bytes_accessed = 4 * (x_flat.size + w_blk.size + shift_col.size + (N * Cout) * out_w)

    # ---------- single-shot Pallas call: no grid, no pipeline overhead ----------
    out_flat = pl.pallas_call(
        kernel,
        out_shape=jax.ShapeDtypeStruct((N * Cout, out_w), jnp.float32),
        in_specs=[
            pl.BlockSpec(memory_space=pltpu.MemorySpace.VMEM),
            pl.BlockSpec(memory_space=pltpu.MemorySpace.VMEM),
            pl.BlockSpec(memory_space=pltpu.MemorySpace.VMEM),
        ],
        out_specs=pl.BlockSpec(memory_space=pltpu.MemorySpace.VMEM),
        cost_estimate=pl.CostEstimate(flops=flops, transcendentals=0,
                                      bytes_accessed=bytes_accessed),
    )(x_flat, w_blk, shift_col)

    # Rows are already (n, co); keep the even (i, j) flat positions = MaxPool2d(2) outputs.
    out = out_flat.reshape(N, Cout, H, WP)[:, :, ::POOL, :W:POOL]      # (N, Cout, H/2, W/2)
    return out.astype(x_nchw.dtype)


def reference(x_nchw, w_oihw, bias, gamma, beta, run_mean, run_var):
    """Pure-JAX reference matching the PyTorch forward (BatchNorm in eval mode)."""
    y = lax.conv_general_dilated(
        x_nchw, w_oihw, window_strides=(1, 1),
        padding=((PAD, PAD), (PAD, PAD)),
        dimension_numbers=("NCHW", "OIHW", "NCHW"))
    y = y + bias[None, :, None, None]
    y = (y - run_mean[None, :, None, None]) / jnp.sqrt(
        run_var[None, :, None, None] + BN_EPS)
    y = y * gamma[None, :, None, None] + beta[None, :, None, None]
    y = jnp.maximum(y, 0.0)
    N, C, H, W = y.shape
    y = y.reshape(N, C, H // POOL, POOL, W // POOL, POOL)
    return jnp.max(y, axis=(3, 5))


if __name__ == "__main__":
    N, Cin, H, W = 2, 4, 16, 16      # hparams['img_shape'] = (4, 16, 16), batch=2
    Cout = 8                         # hparams['net_width'] = 8

    key = jax.random.PRNGKey(0)
    kx, kw_, kb, kg, kbt = jax.random.split(key, 5)

    x = jax.random.normal(kx, (N, Cin, H, W), jnp.float32)
    # Conv2d parameters (OIHW) — deterministic synthetic init.
    w = jax.random.normal(kw_, (Cout, Cin, KH, KW), jnp.float32) * 0.1
    b = jax.random.normal(kb, (Cout,), jnp.float32) * 0.1
    # BatchNorm2d parameters / running stats (eval mode).
    gamma = 1.0 + 0.1 * jax.random.normal(kg, (Cout,), jnp.float32)
    beta = 0.1 * jax.random.normal(kbt, (Cout,), jnp.float32)
    run_mean = jnp.zeros((Cout,), jnp.float32)
    run_var = jnp.ones((Cout,), jnp.float32)
    # TODO(synk): BatchNorm training-mode (batch statistics) is not modeled; eval mode used.

    out = jax.block_until_ready(
        conv_sandwich(x, w, b, gamma, beta, run_mean, run_var))

    ref = jax.block_until_ready(
        reference(x, w, b, gamma, beta, run_mean, run_var))
    np.testing.assert_allclose(np.asarray(out), np.asarray(ref),
                               rtol=1e-4, atol=1e-4)
    assert out.shape == (N, Cout, H // POOL, W // POOL)
    print("KERNEL_OK")
</pallas_src>

<mosaic_0001>
module attributes {stable_mosaic.version = 11 : i64} {
  func.func @conv_sandwich_kernel(%arg0: memref<8x512xf32, #tpu.memory_space<vmem>>, %arg1: memref<9x16x8xf32, #tpu.memory_space<vmem>>, %arg2: memref<16x1xf32, #tpu.memory_space<vmem>>, %arg3: memref<16x288xf32, #tpu.memory_space<vmem>>) attributes {dimension_semantics = [], scalar_prefetch = 0 : i64, scratch_operands = 0 : i64, tpu.core_type = #tpu.core_type<tc>} {
    %cst = arith.constant 0.000000e+00 : f32
    %0 = vector.broadcast %cst : f32 to vector<16x384xf32>
    %c0 = arith.constant 0 : index
    %c0_0 = arith.constant 0 : index
    %c0_1 = arith.constant 0 : index
    %1 = vector.load %arg1[%c0, %c0_0, %c0_1] : memref<9x16x8xf32, #tpu.memory_space<vmem>>, vector<1x16x8xf32>
    %2 = vector.shape_cast %1 : vector<1x16x8xf32> to vector<16x8xf32>
    %c0_2 = arith.constant 0 : index
    %c0_3 = arith.constant 0 : index
    %3 = vector.load %arg0[%c0_2, %c0_3] : memref<8x512xf32, #tpu.memory_space<vmem>>, vector<8x384xf32>
    %cst_4 = arith.constant dense<0.000000e+00> : vector<16x384xf32>
    %4 = tpu.matmul %2, %3, %cst_4 {dimension_numbers = #tpu.dot_dimension_numbers<[1], [0], [0], [1], [0, 0, 1, 1], [], []>} : vector<16x8xf32>, vector<8x384xf32>, vector<16x384xf32> -> vector<16x384xf32>
    %5 = arith.addf %0, %4 : vector<16x384xf32>
    %c1 = arith.constant 1 : index
    %c0_5 = arith.constant 0 : index
    %c0_6 = arith.constant 0 : index
    %6 = vector.load %arg1[%c1, %c0_5, %c0_6] : memref<9x16x8xf32, #tpu.memory_space<vmem>>, vector<1x16x8xf32>
    %7 = vector.shape_cast %6 : vector<1x16x8xf32> to vector<16x8xf32>
    %c0_7 = arith.constant 0 : index
    %c1_8 = arith.constant 1 : index
    %8 = vector.load %arg0[%c0_7, %c1_8] : memref<8x512xf32, #tpu.memory_space<vmem>>, vector<8x384xf32>
    %cst_9 = arith.constant dense<0.000000e+00> : vector<16x384xf32>
    %9 = tpu.matmul %7, %8, %cst_9 {dimension_numbers = #tpu.dot_dimension_numbers<[1], [0], [0], [1], [0, 0, 1, 1], [], []>} : vector<16x8xf32>, vector<8x384xf32>, vector<16x384xf32> -> vector<16x384xf32>
    %10 = arith.addf %5, %9 : vector<16x384xf32>
    %c2 = arith.constant 2 : index
    %c0_10 = arith.constant 0 : index
    %c0_11 = arith.constant 0 : index
    %11 = vector.load %arg1[%c2, %c0_10, %c0_11] : memref<9x16x8xf32, #tpu.memory_space<vmem>>, vector<1x16x8xf32>
    %12 = vector.shape_cast %11 : vector<1x16x8xf32> to vector<16x8xf32>
    %c0_12 = arith.constant 0 : index
    %c2_13 = arith.constant 2 : index
    %13 = vector.load %arg0[%c0_12, %c2_13] : memref<8x512xf32, #tpu.memory_space<vmem>>, vector<8x384xf32>
    %cst_14 = arith.constant dense<0.000000e+00> : vector<16x384xf32>
    %14 = tpu.matmul %12, %13, %cst_14 {dimension_numbers = #tpu.dot_dimension_numbers<[1], [0], [0], [1], [0, 0, 1, 1], [], []>} : vector<16x8xf32>, vector<8x384xf32>, vector<16x384xf32> -> vector<16x384xf32>
    %15 = arith.addf %10, %14 : vector<16x384xf32>
    %c3 = arith.constant 3 : index
    %c0_15 = arith.constant 0 : index
    %c0_16 = arith.constant 0 : index
    %16 = vector.load %arg1[%c3, %c0_15, %c0_16] : memref<9x16x8xf32, #tpu.memory_space<vmem>>, vector<1x16x8xf32>
    %17 = vector.shape_cast %16 : vector<1x16x8xf32> to vector<16x8xf32>
    %c0_17 = arith.constant 0 : index
    %c18 = arith.constant 18 : index
    %18 = vector.load %arg0[%c0_17, %c18] : memref<8x512xf32, #tpu.memory_space<vmem>>, vector<8x384xf32>
    %cst_18 = arith.constant dense<0.000000e+00> : vector<16x384xf32>
    %19 = tpu.matmul %17, %18, %cst_18 {dimension_numbers = #tpu.dot_dimension_numbers<[1], [0], [0], [1], [0, 0, 1, 1], [], []>} : vector<16x8xf32>, vector<8x384xf32>, vector<16x384xf32> -> vector<16x384xf32>
    %20 = arith.addf %15, %19 : vector<16x384xf32>
    %c4 = arith.constant 4 : index
    %c0_19 = arith.constant 0 : index
    %c0_20 = arith.constant 0 : index
    %21 = vector.load %arg1[%c4, %c0_19, %c0_20] : memref<9x16x8xf32, #tpu.memory_space<vmem>>, vector<1x16x8xf32>
    %22 = vector.shape_cast %21 : vector<1x16x8xf32> to vector<16x8xf32>
    %c0_21 = arith.constant 0 : index
    %c19 = arith.constant 19 : index
    %23 = vector.load %arg0[%c0_21, %c19] : memref<8x512xf32, #tpu.memory_space<vmem>>, vector<8x384xf32>
    %cst_22 = arith.constant dense<0.000000e+00> : vector<16x384xf32>
    %24 = tpu.matmul %22, %23, %cst_22 {dimension_numbers = #tpu.dot_dimension_numbers<[1], [0], [0], [1], [0, 0, 1, 1], [], []>} : vector<16x8xf32>, vector<8x384xf32>, vector<16x384xf32> -> vector<16x384xf32>
    %25 = arith.addf %20, %24 : vector<16x384xf32>
    %c5 = arith.constant 5 : index
    %c0_23 = arith.constant 0 : index
    %c0_24 = arith.constant 0 : index
    %26 = vector.load %arg1[%c5, %c0_23, %c0_24] : memref<9x16x8xf32, #tpu.memory_space<vmem>>, vector<1x16x8xf32>
    %27 = vector.shape_cast %26 : vector<1x16x8xf32> to vector<16x8xf32>
    %c0_25 = arith.constant 0 : index
    %c20 = arith.constant 20 : index
    %28 = vector.load %arg0[%c0_25, %c20] : memref<8x512xf32, #tpu.memory_space<vmem>>, vector<8x384xf32>
    %cst_26 = arith.constant dense<0.000000e+00> : vector<16x384xf32>
    %29 = tpu.matmul %27, %28, %cst_26 {dimension_numbers = #tpu.dot_dimension_numbers<[1], [0], [0], [1], [0, 0, 1, 1], [], []>} : vector<16x8xf32>, vector<8x384xf32>, vector<16x384xf32> -> vector<16x384xf32>
    %30 = arith.addf %25, %29 : vector<16x384xf32>
    %c6 = arith.constant 6 : index
    %c0_27 = arith.constant 0 : index
    %c0_28 = arith.constant 0 : index
    %31 = vector.load %arg1[%c6, %c0_27, %c0_28] : memref<9x16x8xf32, #tpu.memory_space<vmem>>, vector<1x16x8xf32>
    %32 = vector.shape_cast %31 : vector<1x16x8xf32> to vector<16x8xf32>
    %c0_29 = arith.constant 0 : index
    %c36 = arith.constant 36 : index
    %33 = vector.load %arg0[%c0_29, %c36] : memref<8x512xf32, #tpu.memory_space<vmem>>, vector<8x384xf32>
    %cst_30 = arith.constant dense<0.000000e+00> : vector<16x384xf32>
    %34 = tpu.matmul %32, %33, %cst_30 {dimension_numbers = #tpu.dot_dimension_numbers<[1], [0], [0], [1], [0, 0, 1, 1], [], []>} : vector<16x8xf32>, vector<8x384xf32>, vector<16x384xf32> -> vector<16x384xf32>
    %35 = arith.addf %30, %34 : vector<16x384xf32>
    %c7 = arith.constant 7 : index
    %c0_31 = arith.constant 0 : index
    %c0_32 = arith.constant 0 : index
    %36 = vector.load %arg1[%c7, %c0_31, %c0_32] : memref<9x16x8xf32, #tpu.memory_space<vmem>>, vector<1x16x8xf32>
    %37 = vector.shape_cast %36 : vector<1x16x8xf32> to vector<16x8xf32>
    %c0_33 = arith.constant 0 : index
    %c37 = arith.constant 37 : index
    %38 = vector.load %arg0[%c0_33, %c37] : memref<8x512xf32, #tpu.memory_space<vmem>>, vector<8x384xf32>
    %cst_34 = arith.constant dense<0.000000e+00> : vector<16x384xf32>
    %39 = tpu.matmul %37, %38, %cst_34 {dimension_numbers = #tpu.dot_dimension_numbers<[1], [0], [0], [1], [0, 0, 1, 1], [], []>} : vector<16x8xf32>, vector<8x384xf32>, vector<16x384xf32> -> vector<16x384xf32>
    %40 = arith.addf %35, %39 : vector<16x384xf32>
    %c8 = arith.constant 8 : index
    %c0_35 = arith.constant 0 : index
    %c0_36 = arith.constant 0 : index
    %41 = vector.load %arg1[%c8, %c0_35, %c0_36] : memref<9x16x8xf32, #tpu.memory_space<vmem>>, vector<1x16x8xf32>
    %42 = vector.shape_cast %41 : vector<1x16x8xf32> to vector<16x8xf32>
    %c0_37 = arith.constant 0 : index
    %c38 = arith.constant 38 : index
    %43 = vector.load %arg0[%c0_37, %c38] : memref<8x512xf32, #tpu.memory_space<vmem>>, vector<8x384xf32>
    %cst_38 = arith.constant dense<0.000000e+00> : vector<16x384xf32>
    %44 = tpu.matmul %42, %43, %cst_38 {dimension_numbers = #tpu.dot_dimension_numbers<[1], [0], [0], [1], [0, 0, 1, 1], [], []>} : vector<16x8xf32>, vector<8x384xf32>, vector<16x384xf32> -> vector<16x384xf32>
    %45 = arith.addf %40, %44 : vector<16x384xf32>
    %c0_39 = arith.constant 0 : index
    %c0_40 = arith.constant 0 : index
    %46 = vector.load %arg2[%c0_39, %c0_40] : memref<16x1xf32, #tpu.memory_space<vmem>>, vector<16x1xf32>
    %47 = vector.broadcast %46 : vector<16x1xf32> to vector<16x384xf32>
    %48 = arith.addf %45, %47 : vector<16x384xf32>
    %49 = vector.extract_strided_slice %48 {offsets = [0, 0], sizes = [16, 288], strides = [1, 1]} : vector<16x384xf32> to vector<16x288xf32>
    %50 = vector.extract_strided_slice %48 {offsets = [0, 1], sizes = [16, 288], strides = [1, 1]} : vector<16x384xf32> to vector<16x288xf32>
    %51 = arith.maximumf %49, %50 : vector<16x288xf32>
    %52 = vector.extract_strided_slice %48 {offsets = [0, 18], sizes = [16, 288], strides = [1, 1]} : vector<16x384xf32> to vector<16x288xf32>
    %53 = vector.extract_strided_slice %48 {offsets = [0, 19], sizes = [16, 288], strides = [1, 1]} : vector<16x384xf32> to vector<16x288xf32>
    %54 = arith.maximumf %52, %53 : vector<16x288xf32>
    %55 = arith.maximumf %51, %54 : vector<16x288xf32>
    %cst_41 = arith.constant 0.000000e+00 : f32
    %56 = vector.broadcast %cst_41 : f32 to vector<16x288xf32>
    %57 = arith.maximumf %55, %56 : vector<16x288xf32>
    %c0_42 = arith.constant 0 : index
    %c0_43 = arith.constant 0 : index
    %58 = vector.load %arg3[%c0_42, %c0_43] : memref<16x288xf32, #tpu.memory_space<vmem>>, vector<16x288xf32>
    tpu.vector_store %arg3[%c0_42, %c0_43], %57 {strides = array<i32>} : memref<16x288xf32, #tpu.memory_space<vmem>>, vector<16x288xf32>,
    return
  }
}

</mosaic_0001>

<bundles_post_ra>
// kernel: tile.8
= control target key start
LH: loop header
LB: loop body
LE: loop exit
PB: predicated region body
PF: predicated region fallthrough
CT: control target
= control target key end

     0   :  { %s22_s0 = inlined_call_operand.vmem [shape: f32[8], index: 0, kind: input, shape index: {}]   ;;  %s23_s1 = inlined_call_operand.vmem [shape: f32[2,8], index: 1, kind: output, shape index: {}]  }
   0x1   :  { %v4_v0 = vld [vmem:[%s22_s0] ss:$0 sm:$0xff] }
   0x2   :  { %5 = vst [vmem:[%s23_s1] sm:$0x3] %v4_v0 }

// kernel: tile.0
= control target key start
LH: loop header
LB: loop body
LE: loop exit
PB: predicated region body
PF: predicated region fallthrough
CT: control target
= control target key end

     0   :  { %s66_s8 = smov 125   ;;  %vm7_vm0 = vcmask 7168   ;;  %s67_s11 = smov 126   ;;  %s117_s0 = inlined_call_operand.vmem [shape: f32[2,8], index: 0, kind: input, shape index: {}]   ;;  %s118_s1 = inlined_call_operand.vmem [shape: f32[16,1], index: 1, kind: output, shape index: {}]  }
   0x1   :  { %v4_v0 = vld [vmem:[%s117_s0] sm:$0x3]  ;;  %s65_s0 = smov 127   ;;  %s68_s12 = smov 124  }
   0x2   :  { %5 = vst [vmem:[#allocation0] sm:$0x3] %v4_v0  ;;  %s69_s13 = smov 123   ;;  %s70_s14 = smov 122  }
   0x3   :  { %s71_s15 = smov 121  }
   0x9   :  { %v9_v1 = vld [vmem:[#allocation0] sm:$0x3]  }
   0xa   :  { %v21_v2 = vld [vmem:[#allocation0] sm:$0x3]   ;;  %10 = vrot.lane.b32.xlu0 %v9_v1, %s65_s0 }
   0xb   :  { %22 = vrot.lane.b32.xlu1 %v21_v2, %s66_s8  ;;  %v15_v3 = vld [vmem:[#allocation0] sm:$0x3]  }
   0xc   :  { %v27_v4 = vld [vmem:[#allocation0] sm:$0x3]  }
   0xd   :  { %v6_v5 = vld [vmem:[#allocation0] sm:$0x3]  }
   0xe   :  { %8 = vst.msk [vmem:[%s118_s1] ss:$8 sm:$0x3] %vm7_vm0, %v6_v5   ;;  %16 = vrot.lane.b32.xlu0 %v15_v3, %s67_s11  ;;  %v33_v6 = vld [vmem:[#allocation0] sm:$0x3]  }
   0xf   :  { %28 = vrot.lane.b32.xlu1 %v27_v4, %s68_s12  ;;  %v39_v7 = vld [vmem:[#allocation0] sm:$0x3]  }
  0x10   :  { %v45_v8 = vld [vmem:[#allocation0] sm:$0x3]  }
  0x12   :  { %34 = vrot.lane.b32.xlu0 %v33_v6, %s69_s13 }
  0x13   :  { %40 = vrot.lane.b32.xlu1 %v39_v7, %s70_s14 }
  0x16   :  { %46 = vrot.lane.b32.xlu0 %v45_v8, %s71_s15 }
  0x7c   :  { %v11_v9 = vpop.permute.xlu0 %10  }
  0x7d   :  { %v23_v10 = vpop.permute.xlu1 %22   ;;  %51 = vst.msk [vmem:[%s118_s1 + $0x1] ss:$8 sm:$0x3] %vm7_vm0, %v11_v9  }
  0x7e   :  { %53 = vst.msk [vmem:[%s118_s1 + $0x3] ss:$8 sm:$0x3] %vm7_vm0, %v23_v10  }
  0x80   :  { %v17_v11 = vpop.permute.xlu0 %16  }
  0x81   :  { %v29_v12 = vpop.permute.xlu1 %28   ;;  %52 = vst.msk [vmem:[%s118_s1 + $0x2] ss:$8 sm:$0x3] %vm7_vm0, %v17_v11  }
  0x82   :  { %54 = vst.msk [vmem:[%s118_s1 + $0x4] ss:$8 sm:$0x3] %vm7_vm0, %v29_v12  }
  0x84   :  { %v35_v13 = vpop.permute.xlu0 %34  }
  0x85   :  { %v41_v14 = vpop.permute.xlu1 %40   ;;  %55 = vst.msk [vmem:[%s118_s1 + $0x5] ss:$8 sm:$0x3] %vm7_vm0, %v35_v13  }
  0x86   :  { %56 = vst.msk [vmem:[%s118_s1 + $0x6] ss:$8 sm:$0x3] %vm7_vm0, %v41_v14  }
  0x88   :  { %v47_v15 = vpop.permute.xlu0 %46  }
  0x89   :  { %57 = vst.msk [vmem:[%s118_s1 + $0x7] ss:$8 sm:$0x3] %vm7_vm0, %v47_v15  }

// kernel: conv_sandwich.1
= control target key start
LH: loop header
LB: loop body
LE: loop exit
PB: predicated region body
PF: predicated region fallthrough
CT: control target
= control target key end

     0   :  { %v1923_v2 = vmov 0.0   ;;  %s1924_s16 = smov 127   ;;  %s1925_s21 = smov 126   ;;  %v1932_v5 = vmov 0   ;;  %vm38_vm0 = vcmask 1039360   ;;  %vm45_vm1 = vcmask 64512   ;;  %s2185_s0 = inlined_call_operand.vmem [shape: f32[8,512], index: 0, kind: input, shape index: {}]   ;;  %s2186_s2 = inlined_call_operand.vmem [shape: f32[16,1], index: 2, kind: input, shape index: {}]   ;;  %s2187_s1 = inlined_call_operand.vmem [shape: f32[9,16,8], index: 1, kind: input, shape index: {}]   ;;  %s2188_s3 = inlined_call_operand.vmem [shape: f32[16,288], index: 3, kind: output, shape index: {}]  }
   0x1   :  { %v1956_v0 = vld [vmem:[%s2185_s0 + $0x8] sm:$0xff]  ;;  %v1961_v1 = vld [vmem:[%s2185_s0] sm:$0xff]  ;;  %116 = vmatprep.mubr.f32.mxu1 %v1923_v2  ;;  %450 = vmatprep.mubr.f32.mxu0 %v1923_v2  ;;  %v1972_v3 = vld [vmem:[%s2185_s0 + $0x10] sm:$0xff]  ;;  %s1926_s22 = smov 110   ;;  %s1928_s23 = smov 108   ;;  %vm373_vm2 = vcmask 1031168  }
   0x2   :  { %32 = vrot.lane.b32.xlu0 %v1956_v0, %s1924_s16  ;;  %30 = vrot.lane.b32.xlu1 %v1961_v1, %s1924_s16  ;;  %v25_v4 = vld [vmem:[%s2185_s0 + $0x18] sm:$0xff]  ;;  %s1927_s0 = smov 109   ;;  %s1929_s24 = smov 92   ;;  %v1636_v6 = vld [vmem:[%s2186_s2] sm:$0xff]  ;;  %vm555_vm3 = vcmask 900096   ;;  %vm737_vm4 = vcmask 891904  }
   0x3   :  { %s1930_s25 = smov 91   ;;  %s1931_s26 = smov 90   ;;  %1921 = vset.pattern.permute.xlu0 %v1932_v5  ;;  %1922 = vset.pattern.permute.xlu1 %v1932_v5  ;;  %v1637_v7 = vld [vmem:[%s2186_s2 + $0x8] sm:$0xff]  ;;  %v1739_v13 = vld [vmem:[%s2187_s1 + $0x10] sm:$0xff]  ;;  %v1740_v18 = vld [vmem:[%s2187_s1 + $0x18] sm:$0xff]  ;;  %vm919_vm5 = vcmask 883712  }
   0x4   :  { %v1749_v21 = vld [vmem:[%s2187_s1 + $0x20] sm:$0xff]  ;;  %v1750_v25 = vld [vmem:[%s2187_s1 + $0x28] sm:$0xff]  ;;  %v1755_v31 = vld [vmem:[%s2187_s1 + $0x30] sm:$0xff]  ;;  %vm1101_vm6 = vcmask 752640   ;;  %vm1283_vm7 = vcmask 744448   ;;  %vm1465_vm8 = vcmask 736256  }
   0x5   :  { %v14_v27 = vld [vmem:[%s2187_s1] sm:$0xff]  ;;  %v15_v34 = vld [vmem:[%s2187_s1 + $0x8] sm:$0xff]  ;;  %v1756_v36 = vld [vmem:[%s2187_s1 + $0x38] sm:$0xff]  ;;  %vm1730_vm9 = vcmask 261120  }
   0x6   :  { %34 = vrot.lane.b32.xlu0 %v1972_v3, %s1924_s16  ;;  %36 = vrot.lane.b32.xlu1 %v25_v4, %s1924_s16  ;;  %v1761_v41 = vld [vmem:[%s2187_s1 + $0x40] sm:$0xff]  ;;  %v1762_v45 = vld [vmem:[%s2187_s1 + $0x48] sm:$0xff] }
   0x7   :  { %v1767_v50 = vld [vmem:[%s2187_s1 + $0x50] sm:$0xff]  ;;  %v1768_v54 = vld [vmem:[%s2187_s1 + $0x58] sm:$0xff]  ;;  %v1773_v59 = vld [vmem:[%s2187_s1 + $0x60] sm:$0xff] }
   0x8   :  { %v1774_v63 = vld [vmem:[%s2187_s1 + $0x68] sm:$0xff]  ;;  %v1779_v5 = vld [vmem:[%s2187_s1 + $0x70] sm:$0xff] }
   0xa   :  { %367 = vrot.lane.b32.xlu0 %v1956_v0, %s1925_s21  ;;  %369 = vrot.lane.b32.xlu1 %v1972_v3, %s1925_s21 }
   0xe   :  { %365 = vrot.lane.b32.xlu0 %v1961_v1, %s1925_s21  ;;  %371 = vrot.lane.b32.xlu1 %v25_v4, %s1925_s21 }
  0x12   :  { %549 = vrot.lane.b32.xlu0 %v1956_v0, %s1926_s22  ;;  %551 = vrot.lane.b32.xlu1 %v1972_v3, %s1926_s22 }
  0x16   :  { %547 = vrot.lane.b32.xlu0 %v1961_v1, %s1926_s22  ;;  %553 = vrot.lane.b32.xlu1 %v25_v4, %s1926_s22 }
  0x1a   :  { %731 = vrot.lane.b32.xlu0 %v1956_v0, %s1927_s0  ;;  %733 = vrot.lane.b32.xlu1 %v1972_v3, %s1927_s0 }
  0x1e   :  { %729 = vrot.lane.b32.xlu0 %v1961_v1, %s1927_s0  ;;  %735 = vrot.lane.b32.xlu1 %v25_v4, %s1927_s0 }
  0x22   :  { %913 = vrot.lane.b32.xlu0 %v1956_v0, %s1928_s23  ;;  %915 = vrot.lane.b32.xlu1 %v1972_v3, %s1928_s23 }
  0x26   :  { %911 = vrot.lane.b32.xlu0 %v1961_v1, %s1928_s23  ;;  %917 = vrot.lane.b32.xlu1 %v25_v4, %s1928_s23 }
  0x2a   :  { %1095 = vrot.lane.b32.xlu0 %v1956_v0, %s1929_s24  ;;  %1097 = vrot.lane.b32.xlu1 %v1972_v3, %s1929_s24 }
  0x2e   :  { %1093 = vrot.lane.b32.xlu0 %v1961_v1, %s1929_s24  ;;  %1099 = vrot.lane.b32.xlu1 %v25_v4, %s1929_s24 }
  0x32   :  { %1277 = vrot.lane.b32.xlu0 %v1956_v0, %s1930_s25  ;;  %1279 = vrot.lane.b32.xlu1 %v1972_v3, %s1930_s25 }
  0x36   :  { %1275 = vrot.lane.b32.xlu0 %v1961_v1, %s1930_s25  ;;  %1281 = vrot.lane.b32.xlu1 %v25_v4, %s1930_s25 }
  0x3a   :  { %1459 = vrot.lane.b32.xlu0 %v1956_v0, %s1931_s26  ;;  %1461 = vrot.lane.b32.xlu1 %v1972_v3, %s1931_s26 }
  0x3e   :  { %1457 = vrot.lane.b32.xlu0 %v1961_v1, %s1931_s26  ;;  %1463 = vrot.lane.b32.xlu1 %v25_v4, %s1931_s26 }
  0x42   :  { %1640 = vperm.xlu0 %1921, %v1636_v6   ;;  %1645 = vperm.xlu1 %1922, %v1637_v7  }
  0x74   :  { %v33_v8 = vpop.permute.xlu0 %32  ;;  %v31_v9 = vpop.permute.xlu1 %30 }
  0x75   :  { %v39_v14 = vsel %vm38_vm0, %v31_v9, %v33_v8  ;;  %v1780_v9 = vld [vmem:[%s2187_s1 + $0x78] sm:$0xff] }
  0x78   :  { %v35_v10 = vpop.permute.xlu0 %34  ;;  %v37_v11 = vpop.permute.xlu1 %36 }
  0x79   :  { %v40_v12 = vsel %vm38_vm0, %v33_v8, %v35_v10  ;;  %v41_v15 = vsel %vm38_vm0, %v35_v10, %v37_v11 }
  0x7a   :  { %52 = vmatprep.subr.mxu1 %v40_v12 }
  0x7b   :  { %53 = vmatpush1.msra.mxu1 %v39_v14  ;;  %v1785_v14 = vld [vmem:[%s2187_s1 + $0x80] sm:$0xff] }
  0x7c   :  { %v368_v16 = vpop.permute.xlu0 %367  ;;  %1741 = vmatmul.mubr.msk.f32.vlgmr.msra.gmra.mrb[0].mxu1 %vm45_vm1, %v1739_v13  ;;  %1818 = vmatprep.subr.mxu1 %v41_v15  ;;  %v370_v17 = vpop.permute.xlu1 %369 }
  0x7d   :  { %1819 = vmatpush3.msra.mxu1 %v41_v15  ;;  %122 = vmatprep.mubr.f32.mxu1 %v1923_v2  ;;  %v375_v19 = vsel %vm373_vm2, %v368_v16, %v370_v17 }
  0x7e   :  { %386 = vmatprep.subr.mxu0 %v375_v19  ;;  %210 = vmatprep.subr.mxu1 %v1956_v0 }
  0x80   :  { %v366_v20 = vpop.permute.xlu0 %365  ;;  %1742 = vmatmul.mubr.msk.f32.gmra.mrb[2].mxu1 %vm45_vm1, %v1740_v18  ;;  %v372_v22 = vpop.permute.xlu1 %371 }
  0x81   :  { %v374_v23 = vsel %vm373_vm2, %v366_v20, %v368_v16  ;;  %1820 = vmatprep.mubr.msk.f32.mxu1 %vm45_vm1, %v1739_v13  ;;  %v376_v29 = vsel %vm373_vm2, %v370_v17, %v372_v22  ;;  %v1786_v16 = vld [vmem:[%s2187_s1 + $0x88] sm:$0xff] }
  0x82   :  { %387 = vmatpush1.msra.mxu0 %v374_v23 }
  0x83   :  { %1751 = vmatmul.mubr.msk.f32.vlgmr.msra.gmra.mrb[0].mxu0 %vm45_vm1, %v1749_v21 }
  0x84   :  { %v550_v24 = vpop.permute.xlu0 %549  ;;  %1821 = vmatmul.mubr.msk.f32.vlgmr.msra.gmra.mrb[4].mxu1 %vm45_vm1, %v1740_v18  ;;  %456 = vmatprep.mubr.f32.mxu0 %v1923_v2  ;;  %v552_v26 = vpop.permute.xlu1 %551 }
  0x85   :  { %211 = vmatpush1.msra.mxu1 %v1961_v1  ;;  %274 = vmatprep.mubr.f32.mxu1 %v1923_v2  ;;  %v557_v28 = vsel %vm555_vm3, %v550_v24, %v552_v26 }
  0x86   :  { %1823 = vmatprep.subr.mxu1 %v1972_v3  ;;  %568 = vmatprep.subr.mxu0 %v557_v28 }
  0x87   :  { %1752 = vmatmul.mubr.msk.f32.gmra.mrb[2].mxu0 %vm45_vm1, %v1750_v25 }
  0x88   :  { %v548_v30 = vpop.permute.xlu0 %547  ;;  %1745 = vmatmul.mubr.msk.f32.vlgmr.msra.gmra.mrb[0].mxu1 %vm45_vm1, %v14_v27  ;;  %632 = vmatprep.mubr.f32.mxu0 %v1923_v2  ;;  %v554_v32 = vpop.permute.xlu1 %553 }
  0x89   :  { %v556_v33 = vsel %vm555_vm3, %v548_v30, %v550_v24  ;;  %1824 = vmatpush3.msra.mxu1 %v1972_v3  ;;  %280 = vmatprep.mubr.f32.mxu1 %v1923_v2  ;;  %v558_v39 = vsel %vm555_vm3, %v552_v26, %v554_v32 }
  0x8a   :  { %569 = vmatpush1.msra.mxu0 %v556_v33  ;;  %1828 = vmatprep.subr.mxu1 %v376_v29 }
  0x8b   :  { %1757 = vmatmul.mubr.msk.f32.vlgmr.msra.gmra.mrb[0].mxu0 %vm45_vm1, %v1755_v31 }
  0x8c   :  { %v732_v35 = vpop.permute.xlu0 %731  ;;  %1746 = vmatmul.mubr.msk.f32.gmra.mrb[2].mxu1 %vm45_vm1, %v15_v34  ;;  %638 = vmatprep.mubr.f32.mxu0 %v1923_v2  ;;  %v734_v37 = vpop.permute.xlu1 %733 }
  0x8d   :  { %1825 = vmatprep.mubr.msk.f32.mxu1 %vm45_vm1, %v14_v27  ;;  %v739_v38 = vsel %vm737_vm4, %v732_v35, %v734_v37 }
  0x8e   :  { %750 = vmatprep.subr.mxu0 %v739_v38 }
  0x8f   :  { %1758 = vmatmul.mubr.msk.f32.gmra.mrb[2].mxu0 %vm45_vm1, %v1756_v36 }
  0x90   :  { %v730_v40 = vpop.permute.xlu0 %729  ;;  %1826 = vmatmul.mubr.msk.f32.vlgmr.msra.gmra.mrb[4].mxu1 %vm45_vm1, %v15_v34  ;;  %814 = vmatprep.mubr.f32.mxu0 %v1923_v2  ;;  %v736_v42 = vpop.permute.xlu1 %735 }
  0x91   :  { %v738_v43 = vsel %vm737_vm4, %v730_v40, %v732_v35  ;;  %1829 = vmatpush3.msra.mxu1 %v376_v29  ;;  %1830 = vmatprep.mubr.msk.f32.mxu1 %vm45_vm1, %v1749_v21  ;;  %v740_v48 = vsel %vm737_vm4, %v734_v37, %v736_v42 }
  0x92   :  { %751 = vmatpush1.msra.mxu0 %v738_v43  ;;  %1833 = vmatprep.subr.mxu1 %v558_v39 }
  0x93   :  { %1763 = vmatmul.mubr.msk.f32.vlgmr.msra.gmra.mrb[0].mxu0 %vm45_vm1, %v1761_v41 }
  0x94   :  { %v914_v44 = vpop.permute.xlu0 %913  ;;  %820 = vmatprep.mubr.f32.mxu0 %v1923_v2  ;;  %v916_v46 = vpop.permute.xlu1 %915 }
  0x95   :  { %v921_v47 = vsel %vm919_vm5, %v914_v44, %v916_v46 }
  0x96   :  { %932 = vmatprep.subr.mxu0 %v921_v47 }
  0x97   :  { %1764 = vmatmul.mubr.msk.f32.gmra.mrb[2].mxu0 %vm45_vm1, %v1762_v45 }
  0x98   :  { %v912_v49 = vpop.permute.xlu0 %911  ;;  %1831 = vmatmul.mubr.msk.f32.vlgmr.msra.gmra.mrb[4].mxu1 %vm45_vm1, %v1750_v25  ;;  %996 = vmatprep.mubr.f32.mxu0 %v1923_v2  ;;  %v918_v51 = vpop.permute.xlu1 %917 }
  0x99   :  { %v920_v52 = vsel %vm919_vm5, %v912_v49, %v914_v44  ;;  %1834 = vmatpush3.msra.mxu1 %v558_v39  ;;  %1835 = vmatprep.mubr.msk.f32.mxu1 %vm45_vm1, %v1755_v31  ;;  %v922_v57 = vsel %vm919_vm5, %v916_v46, %v918_v51 }
  0x9a   :  { %933 = vmatpush1.msra.mxu0 %v920_v52  ;;  %1838 = vmatprep.subr.mxu1 %v740_v48 }
  0x9b   :  { %1769 = vmatmul.mubr.msk.f32.vlgmr.msra.gmra.mrb[0].mxu0 %vm45_vm1, %v1767_v50 }
  0x9c   :  { %v1096_v53 = vpop.permute.xlu0 %1095  ;;  %1002 = vmatprep.mubr.f32.mxu0 %v1923_v2  ;;  %v1098_v55 = vpop.permute.xlu1 %1097 }
  0x9d   :  { %v1103_v56 = vsel %vm1101_vm6, %v1096_v53, %v1098_v55 }
  0x9e   :  { %1114 = vmatprep.subr.mxu0 %v1103_v56 }
  0x9f   :  { %1770 = vmatmul.mubr.msk.f32.gmra.mrb[2].mxu0 %vm45_vm1, %v1768_v54 }
  0xa0   :  { %v1094_v58 = vpop.permute.xlu0 %1093  ;;  %1836 = vmatmul.mubr.msk.f32.vlgmr.msra.gmra.mrb[4].mxu1 %vm45_vm1, %v1756_v36  ;;  %1178 = vmatprep.mubr.f32.mxu0 %v1923_v2  ;;  %v1100_v60 = vpop.permute.xlu1 %1099 }
  0xa1   :  { %v1102_v61 = vsel %vm1101_vm6, %v1094_v58, %v1096_v53  ;;  %1839 = vmatpush3.msra.mxu1 %v740_v48  ;;  %1840 = vmatprep.mubr.msk.f32.mxu1 %vm45_vm1, %v1761_v41  ;;  %v1104_v3 = vsel %vm1101_vm6, %v1098_v55, %v1100_v60 }
  0xa2   :  { %1115 = vmatpush1.msra.mxu0 %v1102_v61  ;;  %1843 = vmatprep.subr.mxu1 %v922_v57 }
  0xa3   :  { %1775 = vmatmul.mubr.msk.f32.vlgmr.msra.gmra.mrb[0].mxu0 %vm45_vm1, %v1773_v59 }
  0xa4   :  { %v1278_v62 = vpop.permute.xlu0 %1277  ;;  %1184 = vmatprep.mubr.f32.mxu0 %v1923_v2  ;;  %v1280_v0 = vpop.permute.xlu1 %1279 }
  0xa5   :  { %v1285_v1 = vsel %vm1283_vm7, %v1278_v62, %v1280_v0 }
  0xa6   :  { %1296 = vmatprep.subr.mxu0 %v1285_v1 }
  0xa7   :  { %1776 = vmatmul.mubr.msk.f32.gmra.mrb[2].mxu0 %vm45_vm1, %v1774_v63 }
  0xa8   :  { %v1276_v4 = vpop.permute.xlu0 %1275  ;;  %1841 = vmatmul.mubr.msk.f32.vlgmr.msra.gmra.mrb[4].mxu1 %vm45_vm1, %v1762_v45  ;;  %1360 = vmatprep.mubr.f32.mxu0 %v1923_v2  ;;  %v1282_v6 = vpop.permute.xlu1 %1281 }
  0xa9   :  { %v1284_v7 = vsel %vm1283_vm7, %v1276_v4, %v1278_v62  ;;  %1844 = vmatpush3.msra.mxu1 %v922_v57  ;;  %1845 = vmatprep.mubr.msk.f32.mxu1 %vm45_vm1, %v1767_v50  ;;  %v1286_v12 = vsel %vm1283_vm7, %v1280_v0, %v1282_v6 }
  0xaa   :  { %1297 = vmatpush1.msra.mxu0 %v1284_v7  ;;  %1848 = vmatprep.subr.mxu1 %v1104_v3 }
  0xab   :  { %1781 = vmatmul.mubr.msk.f32.vlgmr.msra.gmra.mrb[0].mxu0 %vm45_vm1, %v1779_v5 }
  0xac   :  { %v1460_v8 = vpop.permute.xlu0 %1459  ;;  %1366 = vmatprep.mubr.f32.mxu0 %v1923_v2  ;;  %v1462_v10 = vpop.permute.xlu1 %1461 }
  0xad   :  { %v1467_v11 = vsel %vm1465_vm8, %v1460_v8, %v1462_v10 }
  0xae   :  { %1478 = vmatprep.subr.mxu0 %v1467_v11 }
  0xaf   :  { %1782 = vmatmul.mubr.msk.f32.gmra.mrb[2].mxu0 %vm45_vm1, %v1780_v9 }
  0xb0   :  { %v1458_v13 = vpop.permute.xlu0 %1457  ;;  %1846 = vmatmul.mubr.msk.f32.vlgmr.msra.gmra.mrb[4].mxu1 %vm45_vm1, %v1768_v54  ;;  %1542 = vmatprep.mubr.f32.mxu0 %v1923_v2  ;;  %v1464_v17 = vpop.permute.xlu1 %1463 }
  0xb1   :  { %v1466_v15 = vsel %vm1465_vm8, %v1458_v13, %v1460_v8  ;;  %1849 = vmatpush3.msra.mxu1 %v1104_v3  ;;  %1850 = vmatprep.mubr.msk.f32.mxu1 %vm45_vm1, %v1773_v59  ;;  %v1468_v18 = vsel %vm1465_vm8, %v1462_v10, %v1464_v17 }
  0xb2   :  { %1479 = vmatpush1.msra.mxu0 %v1466_v15  ;;  %1853 = vmatprep.subr.mxu1 %v1286_v12 }
  0xb3   :  { %1787 = vmatmul.mubr.msk.f32.vlgmr.msra.gmra.mrb[0].mxu0 %vm45_vm1, %v1785_v14 }
  0xb4   :  { %1548 = vmatprep.mubr.f32.mxu0 %v1923_v2 }
  0xb7   :  { %1788 = vmatmul.mubr.msk.f32.gmra.mrb[2].mxu0 %vm45_vm1, %v1786_v16 }
  0xb8   :  { %1851 = vmatmul.mubr.msk.f32.vlgmr.msra.gmra.mrb[4].mxu1 %vm45_vm1, %v1774_v63 }
  0xb9   :  { %1854 = vmatpush3.msra.mxu1 %v1286_v12  ;;  %1855 = vmatprep.mubr.msk.f32.mxu1 %vm45_vm1, %v1779_v5 }
  0xba   :  { %1858 = vmatprep.subr.mxu1 %v1468_v18 }
  0xc0   :  { %1856 = vmatmul.mubr.msk.f32.vlgmr.msra.gmra.mrb[4].mxu1 %vm45_vm1, %v1780_v9 }
  0xc1   :  { %1859 = vmatpush3.msra.mxu1 %v1468_v18  ;;  %1860 = vmatprep.mubr.msk.f32.mxu1 %vm45_vm1, %v1785_v14  ;;  %v1641_v23 = vpop.permute.xlu0 %1640  ;;  %v1646_v30 = vpop.permute.xlu1 %1645 }
  0xc8   :  { %1861 = vmatmul.mubr.msk.f32.vlgmr.msra.gmra.mrb[4].mxu1 %vm45_vm1, %v1786_v16 }
 0x15b   :  { %v276_v2 = vpop.f32.mrb[0].mxu1 }
 0x15c   :  { %v278_v19 = vpop.f32.mrb[1].mxu1 }
 0x15f   :  { %v282_v20 = vpop.f32.mrb[2].mxu1 }
 0x160   :  { %v284_v21 = vpop.f32.mrb[3].mxu1 }
 0x186   :  { %v1544_v22 = vpop.f32.mrb[0].mxu0 }
 0x187   :  { %v1863_v24 = vadd.f32 %v1544_v22, %v276_v2  ;;  %v1546_v25 = vpop.f32.mrb[1].mxu0 }
 0x188   :  { %v1864_v26 = vadd.f32 %v1546_v25, %v278_v19 }
 0x189   :  { %v1648_v27 = vadd.f32 %v1863_v24, %v1641_v23 }
 0x18a   :  { %v1649_v28 = vadd.f32 %v1864_v26, %v1641_v23  ;;  %v1550_v29 = vpop.f32.mrb[2].mxu0 }
 0x18b   :  { %v1865_v31 = vadd.f32 %v1550_v29, %v282_v20  ;;  %v1552_v32 = vpop.f32.mrb[3].mxu0  ;;  %1660 = vrot.lane.b32.xlu1 %v1648_v27, %s1924_s16 }
 0x18c   :  { %v1866_v33 = vadd.f32 %v1552_v32, %v284_v21  ;;  %1662 = vrot.lane.b32.xlu0 %v1649_v28, %s1924_s16 }
 0x18d   :  { %v1651_v34 = vadd.f32 %v1865_v31, %v1646_v30 }
 0x18e   :  { %v1652_v39 = vadd.f32 %v1866_v33, %v1646_v30 }
 0x190   :  { %1666 = vrot.lane.b32.xlu0 %v1651_v34, %s1924_s16 }
 0x19b   :  { %v1862_v35 = vpop.f32.mrb[4].mxu1 }
 0x19c   :  { %v1653_v36 = vadd.f32 %v1862_v35, %v1646_v30  ;;  %v1621_v37 = vpop.f32.mrb[5].mxu1 }
 0x19d   :  { %v1650_v38 = vadd.f32 %v1641_v23, %v1621_v37 }
 0x19e   :  { %1670 = vrot.lane.b32.xlu0 %v1653_v36, %s1924_s16 }
 0x19f   :  { %1664 = vrot.lane.b32.xlu1 %v1650_v38, %s1924_s16 }
 0x1a3   :  { %1668 = vrot.lane.b32.xlu1 %v1652_v39, %s1924_s16 }
 0x1fd   :  { %v1661_v40 = vpop.permute.xlu1 %1660 }
 0x1fe   :  { %v1663_v41 = vpop.permute.xlu0 %1662 }
 0x1ff   :  { %v1672_v42 = vsel %vm38_vm0, %v1661_v40, %v1663_v41 }
 0x200   :  { %v1682_v43 = vmax.f32 %v1648_v27, %v1672_v42 }
 0x202   :  { %1694 = vrot.lane.b32.xlu1 %v1682_v43, %s1926_s22  ;;  %v1667_v44 = vpop.permute.xlu0 %1666 }
 0x210   :  { %v1671_v47 = vpop.permute.xlu0 %1670 }
 0x211   :  { %v1665_v45 = vpop.permute.xlu1 %1664  ;;  %v1687_v55 = vmax.f32 %v1653_v36, %v1671_v47 }
 0x212   :  { %v1684_v46 = vmax.f32 %v1650_v38, %v1665_v45  ;;  %v1673_v53 = vsel %vm38_vm0, %v1663_v41, %v1665_v45 }
 0x213   :  { %v1683_v54 = vmax.f32 %v1649_v28, %v1673_v53 }
 0x214   :  { %1698 = vrot.lane.b32.xlu1 %v1684_v46, %s1926_s22 }
 0x215   :  { %v1669_v48 = vpop.permute.xlu1 %1668 }
 0x216   :  { %v1674_v49 = vsel %vm38_vm0, %v1667_v44, %v1669_v48  ;;  %v1675_v50 = vsel %vm38_vm0, %v1669_v48, %v1671_v47 }
 0x217   :  { %v1685_v51 = vmax.f32 %v1651_v34, %v1674_v49  ;;  %v1686_v52 = vmax.f32 %v1652_v39, %v1675_v50 }
 0x219   :  { %1702 = vrot.lane.b32.xlu1 %v1686_v52, %s1926_s22  ;;  %1700 = vrot.lane.b32.xlu0 %v1685_v51, %s1926_s22 }
 0x21d   :  { %1696 = vrot.lane.b32.xlu0 %v1683_v54, %s1926_s22 }
 0x221   :  { %1704 = vrot.lane.b32.xlu0 %v1687_v55, %s1926_s22 }
 0x274   :  { %v1695_v56 = vpop.permute.xlu1 %1694 }
 0x286   :  { %v1699_v57 = vpop.permute.xlu1 %1698 }
 0x287   :  { %v1718_v58 = vmax.f32 %v1684_v46, %v1699_v57 }
 0x289   :  { %v1724_v59 = vmax.f32 %v1718_v58, 0.0 }
 0x28b   :  { %1731 = vst.msk [vmem:[%s2188_s3 + $0x10] sm:$0xff] %vm1730_vm9, %v1724_v59  ;;  %v1701_v60 = vpop.permute.xlu0 %1700  ;;  %v1703_v61 = vpop.permute.xlu1 %1702 }
 0x28c   :  { %v1708_v62 = vsel %vm555_vm3, %v1701_v60, %v1703_v61 }
 0x28d   :  { %v1719_v63 = vmax.f32 %v1685_v51, %v1708_v62 }
 0x28f   :  { %v1725_v0 = vmax.f32 %v1719_v63, 0.0  ;;  %v1697_v1 = vpop.permute.xlu0 %1696 }
 0x290   :  { %v1706_v3 = vsel %vm555_vm3, %v1695_v56, %v1697_v1  ;;  %v1707_v4 = vsel %vm555_vm3, %v1697_v1, %v1699_v57 }
 0x291   :  { %1732 = vst [vmem:[%s2188_s3 + $0x18] sm:$0xff] %v1725_v0  ;;  %v1716_v5 = vmax.f32 %v1682_v43, %v1706_v3  ;;  %v1717_v6 = vmax.f32 %v1683_v54, %v1707_v4 }
 0x293   :  { %v1722_v7 = vmax.f32 %v1716_v5, 0.0  ;;  %v1723_v8 = vmax.f32 %v1717_v6, 0.0  ;;  %v1705_v9 = vpop.permute.xlu0 %1704 }
 0x294   :  { %v1709_v10 = vsel %vm555_vm3, %v1703_v61, %v1705_v9  ;;  %v1721_v11 = vmax.f32 %v1687_v55, %v1705_v9 }
 0x295   :  { %1728 = vst [vmem:[%s2188_s3] sm:$0xff] %v1722_v7  ;;  %1729 = vst [vmem:[%s2188_s3 + $0x8] sm:$0xff] %v1723_v8  ;;  %v1720_v12 = vmax.f32 %v1686_v52, %v1709_v10 }
 0x296   :  { %v1727_v13 = vmax.f32 %v1721_v11, 0.0 }
 0x297   :  { %v1726_v14 = vmax.f32 %v1720_v12, 0.0 }
 0x298   :  { %1734 = vst.msk [vmem:[%s2188_s3 + $0x28] sm:$0xff] %vm1730_vm9, %v1727_v13 }
 0x299   :  { %1733 = vst [vmem:[%s2188_s3 + $0x20] sm:$0xff] %v1726_v14 }

</bundles_post_ra>
